<compile_context>
chip_gen: v6e
topology: v6e:2x2x1
jax: 0.10.0
libtpu: 0.0.40
codegen_flags: <defaults>
</compile_context>

<pallas_src>
import functools

import jax
import jax.numpy as jnp
from jax.experimental import pallas as pl
from jax.experimental.pallas import tpu as pltpu

_LANE = 128
_MAX_BLOCK_ROWS = 8192   # (8192,128) f32 = 4 MiB per input block
_ROW_CHUNK = 64          # rows processed per fori_loop step (16 vregs/operand)


def _round_up(x: int, m: int) -> int:
    return ((x + m - 1) // m) * m


def _cdiv(a: int, b: int) -> int:
    return -(-a // b)


def _tile_partial(score_ref, label_ref, *, block_rows, chunk, tile_row_base,
                  batch, masked):
    """Streaming partial sum of this tile into one (8, 128) f32 accumulator."""
    steps = block_rows // chunk
    if masked:
        # Hoisted out of the loop (JAX does not CSE broadcast_in_dim).
        row = jax.lax.broadcasted_iota(jnp.int32, (chunk, _LANE), 0)
        col = jax.lax.broadcasted_iota(jnp.int32, (chunk, _LANE), 1)

    def body(i, acc):
        r0 = pl.multiple_of(i * chunk, chunk)
        s = score_ref[pl.ds(r0, chunk), :]
        l = label_ref[pl.ds(r0, chunk), :]
        # Literal reference formula; exact for arbitrary (even soft) labels.
        z = (l * 2.0 - 1.0) * s
        # Stable softplus(-z) = log(1 + exp(-z)); EUP handles exp/log1p.
        pe = jnp.maximum(-z, 0.0) + jnp.log1p(jnp.exp(-jnp.abs(z)))
        if masked:
            # Zero out padded / out-of-bounds tail elements of the last tile.
            gidx = (tile_row_base + i * chunk + row) * _LANE + col
            pe = jnp.where(gidx < batch, pe, 0.0)
        # Layout-free fold of row groups; pure VPU adds, stays in one vreg.
        return acc + pe.reshape(chunk // 8, 8, _LANE).sum(axis=0)

    return jax.lax.fori_loop(0, steps, body,
                             jnp.zeros((8, _LANE), jnp.float32))


def _custom_loss_kernel(score_ref, label_ref, out_ref, *, block_rows, chunk,
                        batch, num_tiles, needs_mask):
    # score_ref / label_ref: (block_rows, 128) f32 VMEM tiles.
    # out_ref: (1, 8, 128) f32 lane-dense partial-sum slab for this tile.
    t = pl.program_id(0)
    base = t * block_rows

    def run(masked):
        p = _tile_partial(score_ref, label_ref, block_rows=block_rows,
                          chunk=chunk, tile_row_base=base, batch=batch,
                          masked=masked)
        return p[None, :, :]

    if not needs_mask:
        out_ref[...] = run(False)
    elif num_tiles == 1:
        out_ref[...] = run(True)
    else:
        # Only the last tile can contain padded / out-of-bounds elements.
        @pl.when(t < num_tiles - 1)
        def _():
            out_ref[...] = run(False)

        @pl.when(t == num_tiles - 1)
        def _():
            out_ref[...] = run(True)


def custom_loss(score: jax.Array, label: jax.Array) -> jax.Array:
    """score, label: shape (batch,). Returns scalar f32 loss."""
    assert score.shape == label.shape and score.ndim == 1
    batch = score.shape[0]
    # TODO(synk): gidx mask uses int32; guard against >= 2**31-element batches.
    assert 0 < batch < 2 ** 31

    score = score.astype(jnp.float32)
    label = label.astype(jnp.float32)

    # Lay the batch across (rows, 128). Free bitcast when batch % 128 == 0;
    # otherwise pad only the <128-element tail (masked out in the kernel).
    rem = batch % _LANE
    if rem:
        pad = _LANE - rem
        score = jnp.pad(score, (0, pad))
        label = jnp.pad(label, (0, pad))
    rows = score.shape[0] // _LANE
    score2d = score.reshape(rows, _LANE)
    label2d = label.reshape(rows, _LANE)

    # Block sizing: as large as possible (amortize per-step overhead), but at
    # least 2 tiles for medium/large batches so v7x's two TCs both get work,
    # and a multiple of the fori_loop row-chunk.
    block_rows = min(_MAX_BLOCK_ROWS, _round_up(rows, 8))
    if rows > 16:
        block_rows = min(block_rows, _round_up(_cdiv(rows, 2), 8))
    chunk = _ROW_CHUNK if block_rows >= _ROW_CHUNK else block_rows
    block_rows = _round_up(block_rows, chunk)
    num_tiles = _cdiv(rows, block_rows)
    needs_mask = num_tiles * block_rows * _LANE > batch

    kernel = functools.partial(
        _custom_loss_kernel, block_rows=block_rows, chunk=chunk, batch=batch,
        num_tiles=num_tiles, needs_mask=needs_mask)

    partials = pl.pallas_call(
        kernel,
        out_shape=jax.ShapeDtypeStruct((num_tiles, 8, _LANE), jnp.float32),
        grid_spec=pltpu.PrefetchScalarGridSpec(
            num_scalar_prefetch=0,
            grid=(num_tiles,),
            in_specs=[
                pl.BlockSpec((block_rows, _LANE), lambda t: (t, 0)),
                pl.BlockSpec((block_rows, _LANE), lambda t: (t, 0)),
            ],
            out_specs=pl.BlockSpec((1, 8, _LANE), lambda t: (t, 0, 0)),
        ),
        compiler_params=pltpu.CompilerParams(
            dimension_semantics=("parallel",),
            vmem_limit_bytes=32 * 1024 * 1024,
        ),
        cost_estimate=pl.CostEstimate(
            flops=8 * batch,
            transcendentals=2 * batch,
            bytes_accessed=8 * batch + num_tiles * 8 * _LANE * 4,
        ),
    )(score2d, label2d)

    # Single cross-lane/sublane reduction + divide, once, outside the grid.
    return jnp.sum(partials) / jnp.float32(batch)


def _reference_loss(score, label):
    lt = label * 2.0 - 1.0
    return jnp.mean(jnp.log(1.0 + jnp.exp(-lt * score)))


def _check(batch, key):
    k1, k2 = jax.random.split(key)
    s = jax.random.normal(k1, (batch,), dtype=jnp.float32)
    l = jax.random.bernoulli(k2, 0.5, (batch,)).astype(jnp.float32)
    out = custom_loss(s, l)
    jax.block_until_ready(out)
    ref = _reference_loss(s, l)
    assert jnp.allclose(out, ref, atol=1e-5, rtol=1e-4), (batch, out, ref)


if __name__ == "__main__":
    key = jax.random.PRNGKey(0)
    keys = jax.random.split(key, 4)

    _check(8, keys[0])      # tiny, single tile, masked path
    _check(300, keys[1])    # tail padding within one tile
    _check(2048, keys[2])   # batch % 128 == 0: free reshape, no mask at all
    _check(5000, keys[3])   # multi-tile grid, pl.when-gated last-tile mask

    print("KERNEL_OK")
</pallas_src>

<mosaic_0001>
module attributes {stable_mosaic.version = 11 : i64} {
  func.func @_custom_loss_kernel(%arg0: i32, %arg1: memref<8x128xf32, #tpu.memory_space<vmem>>, %arg2: memref<8x128xf32, #tpu.memory_space<vmem>>, %arg3: memref<1x8x128xf32, #tpu.memory_space<vmem>>) attributes {dimension_semantics = [#tpu.dimension_semantics<parallel>], iteration_bounds = array<i64: 1>, scalar_prefetch = 0 : i64, scratch_operands = 0 : i64, tpu.core_type = #tpu.core_type<tc>, window_params = [{transform_indices = @transform_0, window_bounds = array<i64: 8, 128>}, {transform_indices = @transform_1, window_bounds = array<i64: 8, 128>}, {transform_indices = @transform_2, window_bounds = array<i64: 1, 8, 128>}]} {
    %c8_i32 = arith.constant 8 : i32
    %0 = arith.muli %arg0, %c8_i32 : i32
    %1 = tpu.iota {dimensions = array<i32: 0>} : vector<8x128xi32>
    %2 = tpu.iota {dimensions = array<i32: 1>} : vector<8x128xi32>
    %cst = arith.constant 0.000000e+00 : f32
    %3 = vector.broadcast %cst : f32 to vector<8x128xf32>
    %c0_i32 = arith.constant 0 : i32
    %c8_i32_0 = arith.constant 8 : i32
    %4 = arith.muli %c0_i32, %c8_i32_0 : i32
    %5 = tpu.assume_multiple %4, 8 : i32
    %6 = arith.index_cast %5 : i32 to index
    %c0 = arith.constant 0 : index
    %7 = vector.load %arg1[%6, %c0] : memref<8x128xf32, #tpu.memory_space<vmem>>, vector<8x128xf32>
    %8 = arith.index_cast %5 : i32 to index
    %c0_1 = arith.constant 0 : index
    %9 = vector.load %arg2[%8, %c0_1] : memref<8x128xf32, #tpu.memory_space<vmem>>, vector<8x128xf32>
    %cst_2 = arith.constant 2.000000e+00 : f32
    %10 = vector.broadcast %cst_2 : f32 to vector<8x128xf32>
    %11 = arith.mulf %9, %10 : vector<8x128xf32>
    %cst_3 = arith.constant 1.000000e+00 : f32
    %12 = vector.broadcast %cst_3 : f32 to vector<8x128xf32>
    %13 = arith.subf %11, %12 : vector<8x128xf32>
    %14 = arith.mulf %13, %7 : vector<8x128xf32>
    %cst_4 = arith.constant 0.000000e+00 : f32
    %15 = vector.broadcast %cst_4 : f32 to vector<8x128xf32>
    %16 = arith.subf %15, %14 : vector<8x128xf32>
    %cst_5 = arith.constant 0.000000e+00 : f32
    %17 = vector.broadcast %cst_5 : f32 to vector<8x128xf32>
    %18 = arith.maximumf %16, %17 : vector<8x128xf32>
    %19 = math.absf %14 : vector<8x128xf32>
    %cst_6 = arith.constant 0.000000e+00 : f32
    %20 = vector.broadcast %cst_6 : f32 to vector<8x128xf32>
    %21 = arith.subf %20, %19 : vector<8x128xf32>
    %22 = math.exp %21 : vector<8x128xf32>
    %23 = math.log1p %22 : vector<8x128xf32>
    %24 = arith.addf %18, %23 : vector<8x128xf32>
    %c8_i32_7 = arith.constant 8 : i32
    %25 = arith.muli %c0_i32, %c8_i32_7 : i32
    %26 = arith.addi %0, %25 : i32
    %27 = vector.broadcast %26 : i32 to vector<8x128xi32>
    %28 = arith.addi %27, %1 : vector<8x128xi32>
    %c128_i32 = arith.constant 128 : i32
    %29 = vector.broadcast %c128_i32 : i32 to vector<8x128xi32>
    %30 = arith.muli %28, %29 : vector<8x128xi32>
    %31 = arith.addi %30, %2 : vector<8x128xi32>
    %c8_i32_8 = arith.constant 8 : i32
    %32 = vector.broadcast %c8_i32_8 : i32 to vector<8x128xi32>
    %33 = arith.cmpi slt, %31, %32 : vector<8x128xi32>
    %cst_9 = arith.constant 0.000000e+00 : f32
    %34 = vector.broadcast %cst_9 : f32 to vector<8x128xf32>
    %35 = arith.select %33, %24, %34 : vector<8x128xi1>, vector<8x128xf32>
    %36 = vector.shape_cast %35 : vector<8x128xf32> to vector<1x8x128xf32>
    %cst_10 = arith.constant dense<0.000000e+00> : vector<8x128xf32>
    %37 = vector.multi_reduction <add>, %36, %cst_10 [0] : vector<1x8x128xf32> to vector<8x128xf32>
    %38 = arith.addf %3, %37 : vector<8x128xf32>
    %c1_i32 = arith.constant 1 : i32
    %39 = vector.shape_cast %38 : vector<8x128xf32> to vector<1x8x128xf32>
    %c0_11 = arith.constant 0 : index
    %c0_12 = arith.constant 0 : index
    %c0_13 = arith.constant 0 : index
    %40 = vector.load %arg3[%c0_11, %c0_12, %c0_13] : memref<1x8x128xf32, #tpu.memory_space<vmem>>, vector<1x8x128xf32>
    tpu.vector_store %arg3[%c0_11, %c0_12, %c0_13], %39 {strides = array<i32>} : memref<1x8x128xf32, #tpu.memory_space<vmem>>, vector<1x8x128xf32>,
    return
  }
  func.func @transform_0(%arg0: i32) -> (i32, i32) {
    %c0_i32 = arith.constant 0 : i32
    %c0_i32_0 = arith.constant 0 : i32
    return %arg0, %c0_i32 : i32, i32
  }
  func.func @transform_1(%arg0: i32) -> (i32, i32) {
    %c0_i32 = arith.constant 0 : i32
    %c0_i32_0 = arith.constant 0 : i32
    return %arg0, %c0_i32 : i32, i32
  }
  func.func @transform_2(%arg0: i32) -> (i32, i32, i32) {
    %c0_i32 = arith.constant 0 : i32
    %c0_i32_0 = arith.constant 0 : i32
    %c0_i32_1 = arith.constant 0 : i32
    return %arg0, %c0_i32, %c0_i32_0 : i32, i32, i32
  }
}

</mosaic_0001>

<bundles_post_ra>
// kernel: tpu_custom_call.1
= control target key start
LH: loop header
LB: loop body
LE: loop exit
PB: predicated region body
PF: predicated region fallthrough
CT: control target
= control target key end

     0   :  { %7 = vsyncpa [#allocation3], 0  ;;  %s157_s0 = inlined_call_operand.hbm [shape: f32[1,128], index: 0, kind: input, shape index: {}]   ;;  %s158_s1 = inlined_call_operand.vmem [shape: f32[1,128], index: 1, kind: input, shape index: {}]   ;;  %s159_s2 = inlined_call_operand.hbm [shape: f32[1,8,128], index: 2, kind: output, shape index: {}]  }
   0x1   :  { %8 = vsyncpa [#allocation4], 0 }
   0x2   :  { %13 = vsyncadd [#allocation3], 112  ;;  %s129_s9 = smov [#allocation2]  }
   0x3   :  { %s14_s10 = sshll.u32 %s129_s9, 4  ;;  %s15_s10 = int_to_ptr.vmem [resolvable:$true] %s14_s10 }
   0x4   :  { %s93_s11 = scalar_lea.vmem %s15_s10, 16  ;;  %s97_s12 = scalar_lea.vmem %s15_s10, 128 }
   0x5   :  { %p94_p0 = scmp.ne.s32.totalorder %s15_s10, %s93_s11  ;;  %p98_p1 = scmp.lt.s32.totalorder %s15_s10, %s15_s10 }
   0x6   :  { %p99_p2 = scmp.lt.s32.totalorder %s97_s12, %s93_s11 }
   0x8   :  { %p100_p3 = por %p99_p2, %p98_p1 }
   0xa   :  { %p101_p4 = pnand %p100_p3, %p94_p0 }
   0xc   :  { %104 = shalt.err (!%p101_p4)
}
   0xd   :  { %s130_s13 = smov 16   ;;  %s131_s14 = smov 1  }
   0xe   :  { %20 = dma.hbm_to_vmem [thread:$0]  %s157_s0, 16, %s15_s10, [#allocation3], %s130_s13, %s130_s13, %s131_s14  }
   0xf   :  { %125 = dma.done.wait [#allocation3], 128  }
  0x10   :  { %126 = vsyncadd [#allocation3], 4294967168  ;;  %v32_v0 = vld [vmem:[%s158_s1] sm:$0xff]  ;;  %v27_v10 = vlaneseq  ;;  %s132_s0 = smov [#allocation5]  }
  0x11   :  { %v33_v1 = vmul.f32 2.0, %v32_v0  ;;  %v31_v2 = vld [vmem:[#allocation2] sm:$0xff]  ;;  %s67_s1 = sshll.u32 %s132_s0, 4  ;;  %s68_s1 = int_to_ptr.vmem [resolvable:$true] %s67_s1 }
  0x12   :  { %v28_v11 = vshrl.u32 %v27_v10, 7  ;;  %v30_v13 = vand.u32 127, %v27_v10  ;;  %s105_s19 = scalar_lea.vmem %s68_s1, 128  ;;  %p110_p6 = scmp.lt.s32.totalorder %s68_s1, %s68_s1 }
  0x13   :  { %v76_v3 = vadd.f32 -1.0, %v33_v1  ;;  %p106_p5 = scmp.ne.s32.totalorder %s68_s1, %s105_s19  ;;  %p111_p7 = scmp.lt.s32.totalorder %s105_s19, %s105_s19 }
  0x14   :  { %v54_v15 = vmul.u32 128, %v28_v11 }
  0x15   :  { %v35_v4 = vmul.f32 %v76_v3, %v31_v2  ;;  %p112_p8 = por %p111_p7, %p110_p6 }
  0x16   :  { %v55_v19 = vadd.s32 %v54_v15, %v30_v13 }
  0x17   :  { %v38_v5 = vand.u32 2147483647, %v35_v4  ;;  %v36_v16 = vsub.f32 0.0, %v35_v4  ;;  %p113_p9 = pnand %p112_p8, %p106_p5 }
  0x18   :  { %vm56_vm1 = vcmp.lt.s32.totalorder %v55_v19, 8 }
  0x19   :  { %v39_v6 = vsub.f32 0.0, %v38_v5  ;;  %v37_v21 = vmax.f32 %v36_v16, 0.0 }
  0x1b   :  { %v40_v7 = vmul.f32 1.442695, %v39_v6 }
  0x1d   :  { %81 = vpow2.f32 %v40_v7 }
  0x2a   :  { %v82_v8 = vpop.eup %81 }
  0x2b   :  { %v42_v9 = vadd.f32 1.0, %v82_v8  ;;  %v45_v12 = vmul.f32 -0.5, %v82_v8  ;;  %v48_v17 = vand.u32 2147483647, %v82_v8 }
  0x2d   :  { %83 = vlog2.f32 %v42_v9  ;;  %v46_v14 = vadd.f32 1.0, %v45_v12  ;;  %vm49_vm0 = vcmp.lt.f32.partialorder %v48_v17, 0.0004427343 }
  0x2f   :  { %v47_v18 = vmul.f32 %v82_v8, %v46_v14 }
  0x3a   :  { %v84_v20 = vpop.eup %83 }
  0x3b   :  { %v44_v22 = vmul.f32 0.6931472, %v84_v20 }
  0x3d   :  { %v50_v23 = vsel %vm49_vm0, %v47_v18, %v44_v22 }
  0x3e   :  { %v51_v24 = vadd.f32 %v50_v23, %v37_v21 }
  0x40   :  { %v57_v25 = vsel %vm56_vm1, %v51_v24, 0.0 }
  0x41   :  { %60 = vst [vmem:[#allocation5] sm:$0xff] %v57_v25 }
  0x42   :  { %116 = shalt.err (!%p113_p9)
}
  0x43   :  { %70 = dma.vmem_to_hbm [thread:$0]  %s68_s1, 128, %s159_s2, [#allocation4]  }
  0x44   :  { %127 = dma.done.wait [#allocation4], 128  }
  0x45   :  { %128 = vsyncadd [#allocation4], 4294967168 }
  0x46   :  { %74 = vsyncpa [#allocation3], 1 }
  0x47   :  { %75 = vsyncpa [#allocation4], 1 }

</bundles_post_ra>
